<compile_context>
chip_gen: v6e
topology: v6e:2x2x1
jax: 0.10.0
libtpu: 0.0.40
codegen_flags: <defaults>
</compile_context>

<pallas_src>
import functools

import jax
import jax.numpy as jnp
from jax import lax
from jax.experimental import pallas as pl
from jax.experimental.pallas import tpu as pltpu


def _mlp_kernel(x_ref, w1_ref, b1_ref, w2_ref, b2_ref, o_ref, *, chunk_rows):
    """One batch tile of y = sigmoid(relu(x @ W1 + b1) @ W2 + b2).

    x_ref : (2, TR, 128) VMEM  -- 2 input features, TR*128 batch elements
    o_ref : (TR, 128)    VMEM  -- lane-dense, multi-sublane output tile
    w1_ref: (2, 20) SMEM   b1_ref: (20,) SMEM   w2_ref: (20,) SMEM   b2_ref: (1,) SMEM
    """
    k_in = x_ref.shape[0]          # 2
    hidden = w1_ref.shape[1]       # 20
    rows = o_ref.shape[0]          # TR (multiple of chunk_rows)
    num_chunks = rows // chunk_rows

    # Hoist all (~81) loop-invariant SMEM scalar reads out of the chunk loop.
    w1s = [tuple(w1_ref[k, j] for k in range(k_in)) for j in range(hidden)]
    b1s = [b1_ref[j] for j in range(hidden)]
    w2s = [w2_ref[j] for j in range(hidden)]
    b2s = b2_ref[0]

    def chunk_body(c, carry):
        r0 = pl.multiple_of(c * chunk_rows, chunk_rows)
        xs = [x_ref[k, pl.ds(r0, chunk_rows), :] for k in range(k_in)]  # (chunk,128)

        def hidden_unit(j):
            h = xs[0] * w1s[j][0]
            for k in range(1, k_in):
                h = h + xs[k] * w1s[j][k]
            h = jnp.maximum(h + b1s[j], 0.0)          # ReLU
            return h * w2s[j]

        acc = hidden_unit(0)                          # layer-2 accumulator
        for j in range(1, hidden):                    # unrolled VPU FMA chain
            acc = acc + hidden_unit(j)

        z = acc + b2s
        # Sigmoid: exp + approx reciprocal hit the EUP slot; the clamp keeps the
        # Newton refinement finite for very negative z (error < 1e-13 there).
        zc = jnp.maximum(z, -30.0)
        d = 1.0 + jnp.exp(-zc)
        r = pl.reciprocal(d, approx=True)
        y = r * (2.0 - d * r)                         # one Newton step -> f32 accurate
        o_ref[pl.ds(r0, chunk_rows), :] = y.astype(o_ref.dtype)
        return carry

    lax.fori_loop(0, num_chunks, chunk_body, 0)


def _round_up(n, m):
    return ((n + m - 1) // m) * m


@functools.partial(jax.jit, static_argnames=("block_b",))
def net_forward(x, w1, b1, w2, b2, *, block_b=262144):
    """Forward pass of Net.

    x : (B, 2) f32
    w1: (2, 20) f32   (pre-transposed nn.Linear(2, 20).weight)
    b1: (20,)   f32
    w2: (20,)   f32   (flattened nn.Linear(20, 1).weight)
    b2: (1,)    f32
    Returns (B, 1) f32.
    """
    B = x.shape[0]
    block_b = max(1024, (block_b // 1024) * 1024)     # blocks must be (*, 8k, 128)

    # Tile sizing: multiple of 1024; >=32768 elems/tile so the ~0.35us/step
    # overhead stays <5%; aim for >=8 tiles at large B (v7x megacore sharding);
    # then rebalance tiles to minimize tail padding.
    tb = min(block_b,
             _round_up(B, 1024),
             max(32768, _round_up(-(-B // 8), 1024)))
    num_tiles = -(-B // tb)
    tb = _round_up(-(-B // num_tiles), 1024)
    Bp = tb * num_tiles
    TR = tb // 128                                    # rows per tile (mult of 8)
    Rp = Bp // 128
    chunk_rows = 32 if TR % 32 == 0 else (16 if TR % 16 == 0 else 8)

    # Single pad + transpose pass to feature-major (2, Rp, 128). Batch element b
    # maps to (row=b//128, lane=b%128) in both the input and the output.
    xp = jnp.pad(x.astype(jnp.float32), ((0, Bp - B), (0, 0)))      # (Bp, 2)
    xt = jnp.transpose(xp.reshape(Rp, 128, 2), (2, 0, 1))           # (2, Rp, 128)

    smem = pl.BlockSpec(memory_space=pltpu.MemorySpace.SMEM)
    out = pl.pallas_call(
        functools.partial(_mlp_kernel, chunk_rows=chunk_rows),
        out_shape=jax.ShapeDtypeStruct((Rp, 128), jnp.float32),
        grid_spec=pl.GridSpec(
            grid=(num_tiles,),
            in_specs=[
                pl.BlockSpec((2, TR, 128), lambda i: (0, i, 0)),   # x tile (DMA pipelined)
                smem, smem, smem, smem,                            # params: resident
            ],
            out_specs=pl.BlockSpec((TR, 128), lambda i: (i, 0)),   # lane-dense output
        ),
        compiler_params=pltpu.CompilerParams(
            dimension_semantics=("parallel",)),   # shard batch tiles across TCs
    )(xt, w1.astype(jnp.float32), b1.astype(jnp.float32),
      w2.astype(jnp.float32), b2.astype(jnp.float32))

    return out.reshape(Bp)[:B][:, None]               # back to (B, 1)


if __name__ == "__main__":
    key = jax.random.PRNGKey(0)
    kx, k1, k2, k3, k4 = jax.random.split(key, 5)

    # Deterministic parameters (PyTorch-style uniform fan-in init), stored
    # pre-transposed / flattened for the kernel layout:
    #   nn.Linear(2, 20): weight (20, 2) -> w1 (2, 20); bias -> b1 (20,)
    #   nn.Linear(20, 1): weight (1, 20) -> w2 (20,);   bias -> b2 (1,)
    bound1 = 1.0 / jnp.sqrt(2.0)
    w1 = jax.random.uniform(k1, (2, 20), jnp.float32, -bound1, bound1)
    b1 = jax.random.uniform(k2, (20,), jnp.float32, -bound1, bound1)
    bound2 = 1.0 / jnp.sqrt(20.0)
    w2 = jax.random.uniform(k3, (20,), jnp.float32, -bound2, bound2)
    b2 = jax.random.uniform(k4, (1,), jnp.float32, -bound2, bound2)

    def reference(xin):
        h = jnp.maximum(xin @ w1 + b1[None, :], 0.0)
        return jax.nn.sigmoid(h @ w2[:, None] + b2[None, :])

    # B=8: single padded tile. B=300: ragged tail, single tile.
    # B=3000 with block_b=2048: multi-tile grid exercising the batch pipeline.
    for B, blk in ((8, 262144), (300, 262144), (3000, 2048)):
        x = jax.random.normal(jax.random.fold_in(kx, B), (B, 2), jnp.float32)
        out = net_forward(x, w1, b1, w2, b2, block_b=blk)
        jax.block_until_ready(out)
        ref = reference(x)
        assert out.shape == (B, 1)
        assert jnp.allclose(out, ref, atol=1e-5, rtol=1e-5), (
            f"mismatch vs reference at B={B}")

    print("KERNEL_OK")
</pallas_src>

<mosaic_0001>
module attributes {stable_mosaic.version = 11 : i64} {
  func.func @_mlp_kernel(%arg0: i32, %arg1: memref<2x8x128xf32, #tpu.memory_space<vmem>>, %arg2: memref<2x20xf32, #tpu.memory_space<smem>>, %arg3: memref<20xf32, #tpu.memory_space<smem>>, %arg4: memref<20xf32, #tpu.memory_space<smem>>, %arg5: memref<1xf32, #tpu.memory_space<smem>>, %arg6: memref<8x128xf32, #tpu.memory_space<vmem>>) attributes {dimension_semantics = [#tpu.dimension_semantics<parallel>], iteration_bounds = array<i64: 1>, scalar_prefetch = 0 : i64, scratch_operands = 0 : i64, tpu.core_type = #tpu.core_type<tc>, window_params = [{transform_indices = @transform_0, window_bounds = array<i64: 2, 8, 128>}, {transform_indices = @transform_1, window_bounds = array<i64: 2, 20>}, {transform_indices = @transform_2, window_bounds = array<i64: 20>}, {transform_indices = @transform_3, window_bounds = array<i64: 20>}, {transform_indices = @transform_4, window_bounds = array<i64: 1>}, {transform_indices = @transform_5, window_bounds = array<i64: 8, 128>}]} {
    %c0 = arith.constant 0 : index
    %c0_0 = arith.constant 0 : index
    %0 = memref.load %arg2[%c0, %c0_0] : memref<2x20xf32, #tpu.memory_space<smem>>
    %c1 = arith.constant 1 : index
    %c0_1 = arith.constant 0 : index
    %1 = memref.load %arg2[%c1, %c0_1] : memref<2x20xf32, #tpu.memory_space<smem>>
    %c0_2 = arith.constant 0 : index
    %c1_3 = arith.constant 1 : index
    %2 = memref.load %arg2[%c0_2, %c1_3] : memref<2x20xf32, #tpu.memory_space<smem>>
    %c1_4 = arith.constant 1 : index
    %c1_5 = arith.constant 1 : index
    %3 = memref.load %arg2[%c1_4, %c1_5] : memref<2x20xf32, #tpu.memory_space<smem>>
    %c0_6 = arith.constant 0 : index
    %c2 = arith.constant 2 : index
    %4 = memref.load %arg2[%c0_6, %c2] : memref<2x20xf32, #tpu.memory_space<smem>>
    %c1_7 = arith.constant 1 : index
    %c2_8 = arith.constant 2 : index
    %5 = memref.load %arg2[%c1_7, %c2_8] : memref<2x20xf32, #tpu.memory_space<smem>>
    %c0_9 = arith.constant 0 : index
    %c3 = arith.constant 3 : index
    %6 = memref.load %arg2[%c0_9, %c3] : memref<2x20xf32, #tpu.memory_space<smem>>
    %c1_10 = arith.constant 1 : index
    %c3_11 = arith.constant 3 : index
    %7 = memref.load %arg2[%c1_10, %c3_11] : memref<2x20xf32, #tpu.memory_space<smem>>
    %c0_12 = arith.constant 0 : index
    %c4 = arith.constant 4 : index
    %8 = memref.load %arg2[%c0_12, %c4] : memref<2x20xf32, #tpu.memory_space<smem>>
    %c1_13 = arith.constant 1 : index
    %c4_14 = arith.constant 4 : index
    %9 = memref.load %arg2[%c1_13, %c4_14] : memref<2x20xf32, #tpu.memory_space<smem>>
    %c0_15 = arith.constant 0 : index
    %c5 = arith.constant 5 : index
    %10 = memref.load %arg2[%c0_15, %c5] : memref<2x20xf32, #tpu.memory_space<smem>>
    %c1_16 = arith.constant 1 : index
    %c5_17 = arith.constant 5 : index
    %11 = memref.load %arg2[%c1_16, %c5_17] : memref<2x20xf32, #tpu.memory_space<smem>>
    %c0_18 = arith.constant 0 : index
    %c6 = arith.constant 6 : index
    %12 = memref.load %arg2[%c0_18, %c6] : memref<2x20xf32, #tpu.memory_space<smem>>
    %c1_19 = arith.constant 1 : index
    %c6_20 = arith.constant 6 : index
    %13 = memref.load %arg2[%c1_19, %c6_20] : memref<2x20xf32, #tpu.memory_space<smem>>
    %c0_21 = arith.constant 0 : index
    %c7 = arith.constant 7 : index
    %14 = memref.load %arg2[%c0_21, %c7] : memref<2x20xf32, #tpu.memory_space<smem>>
    %c1_22 = arith.constant 1 : index
    %c7_23 = arith.constant 7 : index
    %15 = memref.load %arg2[%c1_22, %c7_23] : memref<2x20xf32, #tpu.memory_space<smem>>
    %c0_24 = arith.constant 0 : index
    %c8 = arith.constant 8 : index
    %16 = memref.load %arg2[%c0_24, %c8] : memref<2x20xf32, #tpu.memory_space<smem>>
    %c1_25 = arith.constant 1 : index
    %c8_26 = arith.constant 8 : index
    %17 = memref.load %arg2[%c1_25, %c8_26] : memref<2x20xf32, #tpu.memory_space<smem>>
    %c0_27 = arith.constant 0 : index
    %c9 = arith.constant 9 : index
    %18 = memref.load %arg2[%c0_27, %c9] : memref<2x20xf32, #tpu.memory_space<smem>>
    %c1_28 = arith.constant 1 : index
    %c9_29 = arith.constant 9 : index
    %19 = memref.load %arg2[%c1_28, %c9_29] : memref<2x20xf32, #tpu.memory_space<smem>>
    %c0_30 = arith.constant 0 : index
    %c10 = arith.constant 10 : index
    %20 = memref.load %arg2[%c0_30, %c10] : memref<2x20xf32, #tpu.memory_space<smem>>
    %c1_31 = arith.constant 1 : index
    %c10_32 = arith.constant 10 : index
    %21 = memref.load %arg2[%c1_31, %c10_32] : memref<2x20xf32, #tpu.memory_space<smem>>
    %c0_33 = arith.constant 0 : index
    %c11 = arith.constant 11 : index
    %22 = memref.load %arg2[%c0_33, %c11] : memref<2x20xf32, #tpu.memory_space<smem>>
    %c1_34 = arith.constant 1 : index
    %c11_35 = arith.constant 11 : index
    %23 = memref.load %arg2[%c1_34, %c11_35] : memref<2x20xf32, #tpu.memory_space<smem>>
    %c0_36 = arith.constant 0 : index
    %c12 = arith.constant 12 : index
    %24 = memref.load %arg2[%c0_36, %c12] : memref<2x20xf32, #tpu.memory_space<smem>>
    %c1_37 = arith.constant 1 : index
    %c12_38 = arith.constant 12 : index
    %25 = memref.load %arg2[%c1_37, %c12_38] : memref<2x20xf32, #tpu.memory_space<smem>>
    %c0_39 = arith.constant 0 : index
    %c13 = arith.constant 13 : index
    %26 = memref.load %arg2[%c0_39, %c13] : memref<2x20xf32, #tpu.memory_space<smem>>
    %c1_40 = arith.constant 1 : index
    %c13_41 = arith.constant 13 : index
    %27 = memref.load %arg2[%c1_40, %c13_41] : memref<2x20xf32, #tpu.memory_space<smem>>
    %c0_42 = arith.constant 0 : index
    %c14 = arith.constant 14 : index
    %28 = memref.load %arg2[%c0_42, %c14] : memref<2x20xf32, #tpu.memory_space<smem>>
    %c1_43 = arith.constant 1 : index
    %c14_44 = arith.constant 14 : index
    %29 = memref.load %arg2[%c1_43, %c14_44] : memref<2x20xf32, #tpu.memory_space<smem>>
    %c0_45 = arith.constant 0 : index
    %c15 = arith.constant 15 : index
    %30 = memref.load %arg2[%c0_45, %c15] : memref<2x20xf32, #tpu.memory_space<smem>>
    %c1_46 = arith.constant 1 : index
    %c15_47 = arith.constant 15 : index
    %31 = memref.load %arg2[%c1_46, %c15_47] : memref<2x20xf32, #tpu.memory_space<smem>>
    %c0_48 = arith.constant 0 : index
    %c16 = arith.constant 16 : index
    %32 = memref.load %arg2[%c0_48, %c16] : memref<2x20xf32, #tpu.memory_space<smem>>
    %c1_49 = arith.constant 1 : index
    %c16_50 = arith.constant 16 : index
    %33 = memref.load %arg2[%c1_49, %c16_50] : memref<2x20xf32, #tpu.memory_space<smem>>
    %c0_51 = arith.constant 0 : index
    %c17 = arith.constant 17 : index
    %34 = memref.load %arg2[%c0_51, %c17] : memref<2x20xf32, #tpu.memory_space<smem>>
    %c1_52 = arith.constant 1 : index
    %c17_53 = arith.constant 17 : index
    %35 = memref.load %arg2[%c1_52, %c17_53] : memref<2x20xf32, #tpu.memory_space<smem>>
    %c0_54 = arith.constant 0 : index
    %c18 = arith.constant 18 : index
    %36 = memref.load %arg2[%c0_54, %c18] : memref<2x20xf32, #tpu.memory_space<smem>>
    %c1_55 = arith.constant 1 : index
    %c18_56 = arith.constant 18 : index
    %37 = memref.load %arg2[%c1_55, %c18_56] : memref<2x20xf32, #tpu.memory_space<smem>>
    %c0_57 = arith.constant 0 : index
    %c19 = arith.constant 19 : index
    %38 = memref.load %arg2[%c0_57, %c19] : memref<2x20xf32, #tpu.memory_space<smem>>
    %c1_58 = arith.constant 1 : index
    %c19_59 = arith.constant 19 : index
    %39 = memref.load %arg2[%c1_58, %c19_59] : memref<2x20xf32, #tpu.memory_space<smem>>
    %c0_60 = arith.constant 0 : index
    %40 = memref.load %arg3[%c0_60] : memref<20xf32, #tpu.memory_space<smem>>
    %c1_61 = arith.constant 1 : index
    %41 = memref.load %arg3[%c1_61] : memref<20xf32, #tpu.memory_space<smem>>
    %c2_62 = arith.constant 2 : index
    %42 = memref.load %arg3[%c2_62] : memref<20xf32, #tpu.memory_space<smem>>
    %c3_63 = arith.constant 3 : index
    %43 = memref.load %arg3[%c3_63] : memref<20xf32, #tpu.memory_space<smem>>
    %c4_64 = arith.constant 4 : index
    %44 = memref.load %arg3[%c4_64] : memref<20xf32, #tpu.memory_space<smem>>
    %c5_65 = arith.constant 5 : index
    %45 = memref.load %arg3[%c5_65] : memref<20xf32, #tpu.memory_space<smem>>
    %c6_66 = arith.constant 6 : index
    %46 = memref.load %arg3[%c6_66] : memref<20xf32, #tpu.memory_space<smem>>
    %c7_67 = arith.constant 7 : index
    %47 = memref.load %arg3[%c7_67] : memref<20xf32, #tpu.memory_space<smem>>
    %c8_68 = arith.constant 8 : index
    %48 = memref.load %arg3[%c8_68] : memref<20xf32, #tpu.memory_space<smem>>
    %c9_69 = arith.constant 9 : index
    %49 = memref.load %arg3[%c9_69] : memref<20xf32, #tpu.memory_space<smem>>
    %c10_70 = arith.constant 10 : index
    %50 = memref.load %arg3[%c10_70] : memref<20xf32, #tpu.memory_space<smem>>
    %c11_71 = arith.constant 11 : index
    %51 = memref.load %arg3[%c11_71] : memref<20xf32, #tpu.memory_space<smem>>
    %c12_72 = arith.constant 12 : index
    %52 = memref.load %arg3[%c12_72] : memref<20xf32, #tpu.memory_space<smem>>
    %c13_73 = arith.constant 13 : index
    %53 = memref.load %arg3[%c13_73] : memref<20xf32, #tpu.memory_space<smem>>
    %c14_74 = arith.constant 14 : index
    %54 = memref.load %arg3[%c14_74] : memref<20xf32, #tpu.memory_space<smem>>
    %c15_75 = arith.constant 15 : index
    %55 = memref.load %arg3[%c15_75] : memref<20xf32, #tpu.memory_space<smem>>
    %c16_76 = arith.constant 16 : index
    %56 = memref.load %arg3[%c16_76] : memref<20xf32, #tpu.memory_space<smem>>
    %c17_77 = arith.constant 17 : index
    %57 = memref.load %arg3[%c17_77] : memref<20xf32, #tpu.memory_space<smem>>
    %c18_78 = arith.constant 18 : index
    %58 = memref.load %arg3[%c18_78] : memref<20xf32, #tpu.memory_space<smem>>
    %c19_79 = arith.constant 19 : index
    %59 = memref.load %arg3[%c19_79] : memref<20xf32, #tpu.memory_space<smem>>
    %c0_80 = arith.constant 0 : index
    %60 = memref.load %arg4[%c0_80] : memref<20xf32, #tpu.memory_space<smem>>
    %c1_81 = arith.constant 1 : index
    %61 = memref.load %arg4[%c1_81] : memref<20xf32, #tpu.memory_space<smem>>
    %c2_82 = arith.constant 2 : index
    %62 = memref.load %arg4[%c2_82] : memref<20xf32, #tpu.memory_space<smem>>
    %c3_83 = arith.constant 3 : index
    %63 = memref.load %arg4[%c3_83] : memref<20xf32, #tpu.memory_space<smem>>
    %c4_84 = arith.constant 4 : index
    %64 = memref.load %arg4[%c4_84] : memref<20xf32, #tpu.memory_space<smem>>
    %c5_85 = arith.constant 5 : index
    %65 = memref.load %arg4[%c5_85] : memref<20xf32, #tpu.memory_space<smem>>
    %c6_86 = arith.constant 6 : index
    %66 = memref.load %arg4[%c6_86] : memref<20xf32, #tpu.memory_space<smem>>
    %c7_87 = arith.constant 7 : index
    %67 = memref.load %arg4[%c7_87] : memref<20xf32, #tpu.memory_space<smem>>
    %c8_88 = arith.constant 8 : index
    %68 = memref.load %arg4[%c8_88] : memref<20xf32, #tpu.memory_space<smem>>
    %c9_89 = arith.constant 9 : index
    %69 = memref.load %arg4[%c9_89] : memref<20xf32, #tpu.memory_space<smem>>
    %c10_90 = arith.constant 10 : index
    %70 = memref.load %arg4[%c10_90] : memref<20xf32, #tpu.memory_space<smem>>
    %c11_91 = arith.constant 11 : index
    %71 = memref.load %arg4[%c11_91] : memref<20xf32, #tpu.memory_space<smem>>
    %c12_92 = arith.constant 12 : index
    %72 = memref.load %arg4[%c12_92] : memref<20xf32, #tpu.memory_space<smem>>
    %c13_93 = arith.constant 13 : index
    %73 = memref.load %arg4[%c13_93] : memref<20xf32, #tpu.memory_space<smem>>
    %c14_94 = arith.constant 14 : index
    %74 = memref.load %arg4[%c14_94] : memref<20xf32, #tpu.memory_space<smem>>
    %c15_95 = arith.constant 15 : index
    %75 = memref.load %arg4[%c15_95] : memref<20xf32, #tpu.memory_space<smem>>
    %c16_96 = arith.constant 16 : index
    %76 = memref.load %arg4[%c16_96] : memref<20xf32, #tpu.memory_space<smem>>
    %c17_97 = arith.constant 17 : index
    %77 = memref.load %arg4[%c17_97] : memref<20xf32, #tpu.memory_space<smem>>
    %c18_98 = arith.constant 18 : index
    %78 = memref.load %arg4[%c18_98] : memref<20xf32, #tpu.memory_space<smem>>
    %c19_99 = arith.constant 19 : index
    %79 = memref.load %arg4[%c19_99] : memref<20xf32, #tpu.memory_space<smem>>
    %c0_100 = arith.constant 0 : index
    %80 = memref.load %arg5[%c0_100] : memref<1xf32, #tpu.memory_space<smem>>
    %c0_i32 = arith.constant 0 : i32
    %c8_i32 = arith.constant 8 : i32
    %81 = arith.muli %c0_i32, %c8_i32 : i32
    %82 = tpu.assume_multiple %81, 8 : i32
    %c0_101 = arith.constant 0 : index
    %83 = arith.index_cast %82 : i32 to index
    %c0_102 = arith.constant 0 : index
    %84 = vector.load %arg1[%c0_101, %83, %c0_102] : memref<2x8x128xf32, #tpu.memory_space<vmem>>, vector<1x8x128xf32>
    %85 = vector.shape_cast %84 : vector<1x8x128xf32> to vector<8x128xf32>
    %c1_103 = arith.constant 1 : index
    %86 = arith.index_cast %82 : i32 to index
    %c0_104 = arith.constant 0 : index
    %87 = vector.load %arg1[%c1_103, %86, %c0_104] : memref<2x8x128xf32, #tpu.memory_space<vmem>>, vector<1x8x128xf32>
    %88 = vector.shape_cast %87 : vector<1x8x128xf32> to vector<8x128xf32>
    %89 = vector.broadcast %0 : f32 to vector<8x128xf32>
    %90 = arith.mulf %85, %89 : vector<8x128xf32>
    %91 = vector.broadcast %1 : f32 to vector<8x128xf32>
    %92 = arith.mulf %88, %91 : vector<8x128xf32>
    %93 = arith.addf %90, %92 : vector<8x128xf32>
    %94 = vector.broadcast %40 : f32 to vector<8x128xf32>
    %95 = arith.addf %93, %94 : vector<8x128xf32>
    %cst = arith.constant 0.000000e+00 : f32
    %96 = vector.broadcast %cst : f32 to vector<8x128xf32>
    %97 = arith.maximumf %95, %96 : vector<8x128xf32>
    %98 = vector.broadcast %60 : f32 to vector<8x128xf32>
    %99 = arith.mulf %97, %98 : vector<8x128xf32>
    %100 = vector.broadcast %2 : f32 to vector<8x128xf32>
    %101 = arith.mulf %85, %100 : vector<8x128xf32>
    %102 = vector.broadcast %3 : f32 to vector<8x128xf32>
    %103 = arith.mulf %88, %102 : vector<8x128xf32>
    %104 = arith.addf %101, %103 : vector<8x128xf32>
    %105 = vector.broadcast %41 : f32 to vector<8x128xf32>
    %106 = arith.addf %104, %105 : vector<8x128xf32>
    %cst_105 = arith.constant 0.000000e+00 : f32
    %107 = vector.broadcast %cst_105 : f32 to vector<8x128xf32>
    %108 = arith.maximumf %106, %107 : vector<8x128xf32>
    %109 = vector.broadcast %61 : f32 to vector<8x128xf32>
    %110 = arith.mulf %108, %109 : vector<8x128xf32>
    %111 = arith.addf %99, %110 : vector<8x128xf32>
    %112 = vector.broadcast %4 : f32 to vector<8x128xf32>
    %113 = arith.mulf %85, %112 : vector<8x128xf32>
    %114 = vector.broadcast %5 : f32 to vector<8x128xf32>
    %115 = arith.mulf %88, %114 : vector<8x128xf32>
    %116 = arith.addf %113, %115 : vector<8x128xf32>
    %117 = vector.broadcast %42 : f32 to vector<8x128xf32>
    %118 = arith.addf %116, %117 : vector<8x128xf32>
    %cst_106 = arith.constant 0.000000e+00 : f32
    %119 = vector.broadcast %cst_106 : f32 to vector<8x128xf32>
    %120 = arith.maximumf %118, %119 : vector<8x128xf32>
    %121 = vector.broadcast %62 : f32 to vector<8x128xf32>
    %122 = arith.mulf %120, %121 : vector<8x128xf32>
    %123 = arith.addf %111, %122 : vector<8x128xf32>
    %124 = vector.broadcast %6 : f32 to vector<8x128xf32>
    %125 = arith.mulf %85, %124 : vector<8x128xf32>
    %126 = vector.broadcast %7 : f32 to vector<8x128xf32>
    %127 = arith.mulf %88, %126 : vector<8x128xf32>
    %128 = arith.addf %125, %127 : vector<8x128xf32>
    %129 = vector.broadcast %43 : f32 to vector<8x128xf32>
    %130 = arith.addf %128, %129 : vector<8x128xf32>
    %cst_107 = arith.constant 0.000000e+00 : f32
    %131 = vector.broadcast %cst_107 : f32 to vector<8x128xf32>
    %132 = arith.maximumf %130, %131 : vector<8x128xf32>
    %133 = vector.broadcast %63 : f32 to vector<8x128xf32>
    %134 = arith.mulf %132, %133 : vector<8x128xf32>
    %135 = arith.addf %123, %134 : vector<8x128xf32>
    %136 = vector.broadcast %8 : f32 to vector<8x128xf32>
    %137 = arith.mulf %85, %136 : vector<8x128xf32>
    %138 = vector.broadcast %9 : f32 to vector<8x128xf32>
    %139 = arith.mulf %88, %138 : vector<8x128xf32>
    %140 = arith.addf %137, %139 : vector<8x128xf32>
    %141 = vector.broadcast %44 : f32 to vector<8x128xf32>
    %142 = arith.addf %140, %141 : vector<8x128xf32>
    %cst_108 = arith.constant 0.000000e+00 : f32
    %143 = vector.broadcast %cst_108 : f32 to vector<8x128xf32>
    %144 = arith.maximumf %142, %143 : vector<8x128xf32>
    %145 = vector.broadcast %64 : f32 to vector<8x128xf32>
    %146 = arith.mulf %144, %145 : vector<8x128xf32>
    %147 = arith.addf %135, %146 : vector<8x128xf32>
    %148 = vector.broadcast %10 : f32 to vector<8x128xf32>
    %149 = arith.mulf %85, %148 : vector<8x128xf32>
    %150 = vector.broadcast %11 : f32 to vector<8x128xf32>
    %151 = arith.mulf %88, %150 : vector<8x128xf32>
    %152 = arith.addf %149, %151 : vector<8x128xf32>
    %153 = vector.broadcast %45 : f32 to vector<8x128xf32>
    %154 = arith.addf %152, %153 : vector<8x128xf32>
    %cst_109 = arith.constant 0.000000e+00 : f32
    %155 = vector.broadcast %cst_109 : f32 to vector<8x128xf32>
    %156 = arith.maximumf %154, %155 : vector<8x128xf32>
    %157 = vector.broadcast %65 : f32 to vector<8x128xf32>
    %158 = arith.mulf %156, %157 : vector<8x128xf32>
    %159 = arith.addf %147, %158 : vector<8x128xf32>
    %160 = vector.broadcast %12 : f32 to vector<8x128xf32>
    %161 = arith.mulf %85, %160 : vector<8x128xf32>
    %162 = vector.broadcast %13 : f32 to vector<8x128xf32>
    %163 = arith.mulf %88, %162 : vector<8x128xf32>
    %164 = arith.addf %161, %163 : vector<8x128xf32>
    %165 = vector.broadcast %46 : f32 to vector<8x128xf32>
    %166 = arith.addf %164, %165 : vector<8x128xf32>
    %cst_110 = arith.constant 0.000000e+00 : f32
    %167 = vector.broadcast %cst_110 : f32 to vector<8x128xf32>
    %168 = arith.maximumf %166, %167 : vector<8x128xf32>
    %169 = vector.broadcast %66 : f32 to vector<8x128xf32>
    %170 = arith.mulf %168, %169 : vector<8x128xf32>
    %171 = arith.addf %159, %170 : vector<8x128xf32>
    %172 = vector.broadcast %14 : f32 to vector<8x128xf32>
    %173 = arith.mulf %85, %172 : vector<8x128xf32>
    %174 = vector.broadcast %15 : f32 to vector<8x128xf32>
    %175 = arith.mulf %88, %174 : vector<8x128xf32>
    %176 = arith.addf %173, %175 : vector<8x128xf32>
    %177 = vector.broadcast %47 : f32 to vector<8x128xf32>
    %178 = arith.addf %176, %177 : vector<8x128xf32>
    %cst_111 = arith.constant 0.000000e+00 : f32
    %179 = vector.broadcast %cst_111 : f32 to vector<8x128xf32>
    %180 = arith.maximumf %178, %179 : vector<8x128xf32>
    %181 = vector.broadcast %67 : f32 to vector<8x128xf32>
    %182 = arith.mulf %180, %181 : vector<8x128xf32>
    %183 = arith.addf %171, %182 : vector<8x128xf32>
    %184 = vector.broadcast %16 : f32 to vector<8x128xf32>
    %185 = arith.mulf %85, %184 : vector<8x128xf32>
    %186 = vector.broadcast %17 : f32 to vector<8x128xf32>
    %187 = arith.mulf %88, %186 : vector<8x128xf32>
    %188 = arith.addf %185, %187 : vector<8x128xf32>
    %189 = vector.broadcast %48 : f32 to vector<8x128xf32>
    %190 = arith.addf %188, %189 : vector<8x128xf32>
    %cst_112 = arith.constant 0.000000e+00 : f32
    %191 = vector.broadcast %cst_112 : f32 to vector<8x128xf32>
    %192 = arith.maximumf %190, %191 : vector<8x128xf32>
    %193 = vector.broadcast %68 : f32 to vector<8x128xf32>
    %194 = arith.mulf %192, %193 : vector<8x128xf32>
    %195 = arith.addf %183, %194 : vector<8x128xf32>
    %196 = vector.broadcast %18 : f32 to vector<8x128xf32>
    %197 = arith.mulf %85, %196 : vector<8x128xf32>
    %198 = vector.broadcast %19 : f32 to vector<8x128xf32>
    %199 = arith.mulf %88, %198 : vector<8x128xf32>
    %200 = arith.addf %197, %199 : vector<8x128xf32>
    %201 = vector.broadcast %49 : f32 to vector<8x128xf32>
    %202 = arith.addf %200, %201 : vector<8x128xf32>
    %cst_113 = arith.constant 0.000000e+00 : f32
    %203 = vector.broadcast %cst_113 : f32 to vector<8x128xf32>
    %204 = arith.maximumf %202, %203 : vector<8x128xf32>
    %205 = vector.broadcast %69 : f32 to vector<8x128xf32>
    %206 = arith.mulf %204, %205 : vector<8x128xf32>
    %207 = arith.addf %195, %206 : vector<8x128xf32>
    %208 = vector.broadcast %20 : f32 to vector<8x128xf32>
    %209 = arith.mulf %85, %208 : vector<8x128xf32>
    %210 = vector.broadcast %21 : f32 to vector<8x128xf32>
    %211 = arith.mulf %88, %210 : vector<8x128xf32>
    %212 = arith.addf %209, %211 : vector<8x128xf32>
    %213 = vector.broadcast %50 : f32 to vector<8x128xf32>
    %214 = arith.addf %212, %213 : vector<8x128xf32>
    %cst_114 = arith.constant 0.000000e+00 : f32
    %215 = vector.broadcast %cst_114 : f32 to vector<8x128xf32>
    %216 = arith.maximumf %214, %215 : vector<8x128xf32>
    %217 = vector.broadcast %70 : f32 to vector<8x128xf32>
    %218 = arith.mulf %216, %217 : vector<8x128xf32>
    %219 = arith.addf %207, %218 : vector<8x128xf32>
    %220 = vector.broadcast %22 : f32 to vector<8x128xf32>
    %221 = arith.mulf %85, %220 : vector<8x128xf32>
    %222 = vector.broadcast %23 : f32 to vector<8x128xf32>
    %223 = arith.mulf %88, %222 : vector<8x128xf32>
    %224 = arith.addf %221, %223 : vector<8x128xf32>
    %225 = vector.broadcast %51 : f32 to vector<8x128xf32>
    %226 = arith.addf %224, %225 : vector<8x128xf32>
    %cst_115 = arith.constant 0.000000e+00 : f32
    %227 = vector.broadcast %cst_115 : f32 to vector<8x128xf32>
    %228 = arith.maximumf %226, %227 : vector<8x128xf32>
    %229 = vector.broadcast %71 : f32 to vector<8x128xf32>
    %230 = arith.mulf %228, %229 : vector<8x128xf32>
    %231 = arith.addf %219, %230 : vector<8x128xf32>
    %232 = vector.broadcast %24 : f32 to vector<8x128xf32>
    %233 = arith.mulf %85, %232 : vector<8x128xf32>
    %234 = vector.broadcast %25 : f32 to vector<8x128xf32>
    %235 = arith.mulf %88, %234 : vector<8x128xf32>
    %236 = arith.addf %233, %235 : vector<8x128xf32>
    %237 = vector.broadcast %52 : f32 to vector<8x128xf32>
    %238 = arith.addf %236, %237 : vector<8x128xf32>
    %cst_116 = arith.constant 0.000000e+00 : f32
    %239 = vector.broadcast %cst_116 : f32 to vector<8x128xf32>
    %240 = arith.maximumf %238, %239 : vector<8x128xf32>
    %241 = vector.broadcast %72 : f32 to vector<8x128xf32>
    %242 = arith.mulf %240, %241 : vector<8x128xf32>
    %243 = arith.addf %231, %242 : vector<8x128xf32>
    %244 = vector.broadcast %26 : f32 to vector<8x128xf32>
    %245 = arith.mulf %85, %244 : vector<8x128xf32>
    %246 = vector.broadcast %27 : f32 to vector<8x128xf32>
    %247 = arith.mulf %88, %246 : vector<8x128xf32>
    %248 = arith.addf %245, %247 : vector<8x128xf32>
    %249 = vector.broadcast %53 : f32 to vector<8x128xf32>
    %250 = arith.addf %248, %249 : vector<8x128xf32>
    %cst_117 = arith.constant 0.000000e+00 : f32
    %251 = vector.broadcast %cst_117 : f32 to vector<8x128xf32>
    %252 = arith.maximumf %250, %251 : vector<8x128xf32>
    %253 = vector.broadcast %73 : f32 to vector<8x128xf32>
    %254 = arith.mulf %252, %253 : vector<8x128xf32>
    %255 = arith.addf %243, %254 : vector<8x128xf32>
    %256 = vector.broadcast %28 : f32 to vector<8x128xf32>
    %257 = arith.mulf %85, %256 : vector<8x128xf32>
    %258 = vector.broadcast %29 : f32 to vector<8x128xf32>
    %259 = arith.mulf %88, %258 : vector<8x128xf32>
    %260 = arith.addf %257, %259 : vector<8x128xf32>
    %261 = vector.broadcast %54 : f32 to vector<8x128xf32>
    %262 = arith.addf %260, %261 : vector<8x128xf32>
    %cst_118 = arith.constant 0.000000e+00 : f32
    %263 = vector.broadcast %cst_118 : f32 to vector<8x128xf32>
    %264 = arith.maximumf %262, %263 : vector<8x128xf32>
    %265 = vector.broadcast %74 : f32 to vector<8x128xf32>
    %266 = arith.mulf %264, %265 : vector<8x128xf32>
    %267 = arith.addf %255, %266 : vector<8x128xf32>
    %268 = vector.broadcast %30 : f32 to vector<8x128xf32>
    %269 = arith.mulf %85, %268 : vector<8x128xf32>
    %270 = vector.broadcast %31 : f32 to vector<8x128xf32>
    %271 = arith.mulf %88, %270 : vector<8x128xf32>
    %272 = arith.addf %269, %271 : vector<8x128xf32>
    %273 = vector.broadcast %55 : f32 to vector<8x128xf32>
    %274 = arith.addf %272, %273 : vector<8x128xf32>
    %cst_119 = arith.constant 0.000000e+00 : f32
    %275 = vector.broadcast %cst_119 : f32 to vector<8x128xf32>
    %276 = arith.maximumf %274, %275 : vector<8x128xf32>
    %277 = vector.broadcast %75 : f32 to vector<8x128xf32>
    %278 = arith.mulf %276, %277 : vector<8x128xf32>
    %279 = arith.addf %267, %278 : vector<8x128xf32>
    %280 = vector.broadcast %32 : f32 to vector<8x128xf32>
    %281 = arith.mulf %85, %280 : vector<8x128xf32>
    %282 = vector.broadcast %33 : f32 to vector<8x128xf32>
    %283 = arith.mulf %88, %282 : vector<8x128xf32>
    %284 = arith.addf %281, %283 : vector<8x128xf32>
    %285 = vector.broadcast %56 : f32 to vector<8x128xf32>
    %286 = arith.addf %284, %285 : vector<8x128xf32>
    %cst_120 = arith.constant 0.000000e+00 : f32
    %287 = vector.broadcast %cst_120 : f32 to vector<8x128xf32>
    %288 = arith.maximumf %286, %287 : vector<8x128xf32>
    %289 = vector.broadcast %76 : f32 to vector<8x128xf32>
    %290 = arith.mulf %288, %289 : vector<8x128xf32>
    %291 = arith.addf %279, %290 : vector<8x128xf32>
    %292 = vector.broadcast %34 : f32 to vector<8x128xf32>
    %293 = arith.mulf %85, %292 : vector<8x128xf32>
    %294 = vector.broadcast %35 : f32 to vector<8x128xf32>
    %295 = arith.mulf %88, %294 : vector<8x128xf32>
    %296 = arith.addf %293, %295 : vector<8x128xf32>
    %297 = vector.broadcast %57 : f32 to vector<8x128xf32>
    %298 = arith.addf %296, %297 : vector<8x128xf32>
    %cst_121 = arith.constant 0.000000e+00 : f32
    %299 = vector.broadcast %cst_121 : f32 to vector<8x128xf32>
    %300 = arith.maximumf %298, %299 : vector<8x128xf32>
    %301 = vector.broadcast %77 : f32 to vector<8x128xf32>
    %302 = arith.mulf %300, %301 : vector<8x128xf32>
    %303 = arith.addf %291, %302 : vector<8x128xf32>
    %304 = vector.broadcast %36 : f32 to vector<8x128xf32>
    %305 = arith.mulf %85, %304 : vector<8x128xf32>
    %306 = vector.broadcast %37 : f32 to vector<8x128xf32>
    %307 = arith.mulf %88, %306 : vector<8x128xf32>
    %308 = arith.addf %305, %307 : vector<8x128xf32>
    %309 = vector.broadcast %58 : f32 to vector<8x128xf32>
    %310 = arith.addf %308, %309 : vector<8x128xf32>
    %cst_122 = arith.constant 0.000000e+00 : f32
    %311 = vector.broadcast %cst_122 : f32 to vector<8x128xf32>
    %312 = arith.maximumf %310, %311 : vector<8x128xf32>
    %313 = vector.broadcast %78 : f32 to vector<8x128xf32>
    %314 = arith.mulf %312, %313 : vector<8x128xf32>
    %315 = arith.addf %303, %314 : vector<8x128xf32>
    %316 = vector.broadcast %38 : f32 to vector<8x128xf32>
    %317 = arith.mulf %85, %316 : vector<8x128xf32>
    %318 = vector.broadcast %39 : f32 to vector<8x128xf32>
    %319 = arith.mulf %88, %318 : vector<8x128xf32>
    %320 = arith.addf %317, %319 : vector<8x128xf32>
    %321 = vector.broadcast %59 : f32 to vector<8x128xf32>
    %322 = arith.addf %320, %321 : vector<8x128xf32>
    %cst_123 = arith.constant 0.000000e+00 : f32
    %323 = vector.broadcast %cst_123 : f32 to vector<8x128xf32>
    %324 = arith.maximumf %322, %323 : vector<8x128xf32>
    %325 = vector.broadcast %79 : f32 to vector<8x128xf32>
    %326 = arith.mulf %324, %325 : vector<8x128xf32>
    %327 = arith.addf %315, %326 : vector<8x128xf32>
    %328 = vector.broadcast %80 : f32 to vector<8x128xf32>
    %329 = arith.addf %327, %328 : vector<8x128xf32>
    %cst_124 = arith.constant -3.000000e+01 : f32
    %330 = vector.broadcast %cst_124 : f32 to vector<8x128xf32>
    %331 = arith.maximumf %329, %330 : vector<8x128xf32>
    %cst_125 = arith.constant 0.000000e+00 : f32
    %332 = vector.broadcast %cst_125 : f32 to vector<8x128xf32>
    %333 = arith.subf %332, %331 : vector<8x128xf32>
    %334 = math.exp %333 : vector<8x128xf32>
    %cst_126 = arith.constant 1.000000e+00 : f32
    %335 = vector.broadcast %cst_126 : f32 to vector<8x128xf32>
    %336 = arith.addf %335, %334 : vector<8x128xf32>
    %337 = tpu.reciprocal %336 {approx = true} : vector<8x128xf32> -> vector<8x128xf32>
    %338 = arith.mulf %336, %337 : vector<8x128xf32>
    %cst_127 = arith.constant 2.000000e+00 : f32
    %339 = vector.broadcast %cst_127 : f32 to vector<8x128xf32>
    %340 = arith.subf %339, %338 : vector<8x128xf32>
    %341 = arith.mulf %337, %340 : vector<8x128xf32>
    %342 = arith.index_cast %82 : i32 to index
    %c0_128 = arith.constant 0 : index
    %343 = vector.load %arg6[%342, %c0_128] : memref<8x128xf32, #tpu.memory_space<vmem>>, vector<8x128xf32>
    tpu.vector_store %arg6[%342, %c0_128], %341 {strides = array<i32>} : memref<8x128xf32, #tpu.memory_space<vmem>>, vector<8x128xf32>,
    %c1_i32 = arith.constant 1 : i32
    return
  }
  func.func @transform_0(%arg0: i32) -> (i32, i32, i32) {
    %c0_i32 = arith.constant 0 : i32
    %c0_i32_0 = arith.constant 0 : i32
    %c0_i32_1 = arith.constant 0 : i32
    return %c0_i32, %arg0, %c0_i32_0 : i32, i32, i32
  }
  func.func @transform_1(%arg0: i32) -> (i32, i32) {
    %c0_i32 = arith.constant 0 : i32
    %c0_i32_0 = arith.constant 0 : i32
    %c0_i32_1 = arith.constant 0 : i32
    return %c0_i32, %c0_i32_0 : i32, i32
  }
  func.func @transform_2(%arg0: i32) -> i32 {
    %c0_i32 = arith.constant 0 : i32
    %c0_i32_0 = arith.constant 0 : i32
    return %c0_i32 : i32
  }
  func.func @transform_3(%arg0: i32) -> i32 {
    %c0_i32 = arith.constant 0 : i32
    %c0_i32_0 = arith.constant 0 : i32
    return %c0_i32 : i32
  }
  func.func @transform_4(%arg0: i32) -> i32 {
    %c0_i32 = arith.constant 0 : i32
    %c0_i32_0 = arith.constant 0 : i32
    return %c0_i32 : i32
  }
  func.func @transform_5(%arg0: i32) -> (i32, i32) {
    %c0_i32 = arith.constant 0 : i32
    %c0_i32_0 = arith.constant 0 : i32
    return %arg0, %c0_i32 : i32, i32
  }
}

</mosaic_0001>

<bundles_post_ra>
// kernel: net_forward.1
= control target key start
LH: loop header
LB: loop body
LE: loop exit
PB: predicated region body
PF: predicated region fallthrough
CT: control target
= control target key end

     0   :  { %s867_s0 = inlined_call_operand.vmem [shape: f32[2,8,128], index: 0, kind: input, shape index: {}]   ;;  %s868_s1 = inlined_call_operand.vmem [shape: f32[2,20], index: 1, kind: input, shape index: {}]   ;;  %s869_s2 = inlined_call_operand.vmem [shape: f32[20], index: 2, kind: input, shape index: {}]   ;;  %s870_s3 = inlined_call_operand.vmem [shape: f32[20], index: 3, kind: input, shape index: {}]   ;;  %s871_s4 = inlined_call_operand.<no memory space> [shape: f32[1], index: 4, kind: input, shape index: {}]   ;;  %s872_s5 = inlined_call_operand.vmem [shape: f32[8,128], index: 5, kind: output, shape index: {}]  }
   0x1   :  { %873 = sst [smem:[#allocation19_spill]] %s871_s4 }
   0x2   :  { %874 = sst [smem:[#allocation20_spill]] %s872_s5 }
   0x3   :  { %11 = vsyncpa [#allocation4], 0 }
   0x4   :  { %12 = vsyncpa [#allocation6], 0  ;;  %s31_s20 = sshll.u32 %s869_s2, 4  ;;  %s21_s23 = sshll.u32 %s868_s1, 4  ;;  %s32_s20 = int_to_ptr.vmem [resolvable:$true] %s31_s20  ;;  %s22_s23 = int_to_ptr.vmem [resolvable:$true] %s21_s23 }
   0x5   :  { %s465_s24 = scalar_lea.vmem %s32_s20, 16  ;;  %p470_p1 = scmp.lt.s32.totalorder %s32_s20, %s32_s20 }
   0x6   :  { %p466_p0 = scmp.ne.s32.totalorder %s32_s20, %s465_s24  ;;  %p471_p2 = scmp.lt.s32.totalorder %s465_s24, %s465_s24 }
   0x8   :  { %p472_p3 = por %p471_p2, %p470_p1 }
   0xa   :  { %p473_p4 = pnand %p472_p3, %p466_p0 }
   0xc   :  { %476 = shalt.err (!%p473_p4)
}
   0xd   :  { %s505_s25 = smov [#allocation5]   ;;  %s477_s26 = scalar_lea.vmem %s22_s23, 32 }
   0xe   :  { %34 = dma.vmem_to_smem %s32_s20, 16, %s505_s25, [#allocation6]  }
   0xf   :  { %p478_p5 = scmp.ne.s32.totalorder %s22_s23, %s477_s26  ;;  %p482_p6 = scmp.lt.s32.totalorder %s22_s23, %s22_s23 }
  0x10   :  { %p483_p7 = scmp.lt.s32.totalorder %s477_s26, %s477_s26 }
  0x12   :  { %p484_p8 = por %p483_p7, %p482_p6 }
  0x14   :  { %p485_p9 = pnand %p484_p8, %p478_p5 }
  0x16   :  { %488 = shalt.err (!%p485_p9)
}
  0x17   :  { %s506_s2 = smov [#allocation3]   ;;  %s41_s28 = sshll.u32 %s870_s3, 4  ;;  %s42_s28 = int_to_ptr.vmem [resolvable:$true] %s41_s28 }
  0x18   :  { %24 = dma.vmem_to_smem %s22_s23, 32, %s506_s2, [#allocation4]  }
  0x19   :  { %s489_s29 = scalar_lea.vmem %s42_s28, 16  ;;  %p494_p11 = scmp.lt.s32.totalorder %s42_s28, %s42_s28 }
  0x1a   :  { %p490_p10 = scmp.ne.s32.totalorder %s42_s28, %s489_s29  ;;  %p495_p12 = scmp.lt.s32.totalorder %s489_s29, %s489_s29 }
  0x1c   :  { %p496_p13 = por %p495_p12, %p494_p11 }
  0x1e   :  { %p497_p0 = pnand %p496_p13, %p490_p10 }
  0x20   :  { %500 = shalt.err (!%p497_p0)
}
  0x21   :  { %s507_s30 = smov [#allocation7]  }
  0x22   :  { %44 = dma.vmem_to_smem %s42_s28, 16, %s507_s30, [#allocation6]  }
  0x23   :  { %501 = dma.done.wait [#allocation4], 32  }
  0x24   :  { %502 = vsyncadd [#allocation4], 4294967264 }
  0x25   :  { %503 = dma.done.wait [#allocation6], 32  }
  0x26   :  { %504 = vsyncadd [#allocation6], 4294967264 }
  0x27   :  { %56 = sfence }
  0x28   :  { %s547_s6 = sld [smem:[#allocation3]]  ;;  %v616_v0 = vld [vmem:[%s867_s0] sm:$0xff]  ;;  %v621_v1 = vld [vmem:[%s867_s0 + $0x8] sm:$0xff] }
  0x29   :  { %s549_s7 = sld [smem:[#allocation3 + $0x80]] }
  0x2a   :  { %s551_s3 = sld [smem:[#allocation3 + $0x1]] }
  0x2b   :  { %s553_s8 = sld [smem:[#allocation3 + $0x81]] }
  0x2c   :  { %s555_s9 = sld [smem:[#allocation3 + $0x2]] }
  0x2d   :  { %s557_s10 = sld [smem:[#allocation3 + $0x82]] }
  0x2e   :  { %s559_s11 = sld [smem:[#allocation3 + $0x3]]  ;;  %v142_v2 = vstv %s547_s6 }
  0x2f   :  { %s561_s12 = sld [smem:[#allocation3 + $0x83]]  ;;  %v144_v3 = vstv %s549_s7  ;;  %v143_v10 = vmul.f32 %v142_v2, %v616_v0 }
  0x30   :  { %s563_s13 = sld [smem:[#allocation3 + $0x4]]  ;;  %v152_v4 = vstv %s551_s3  ;;  %v145_v11 = vmul.f32 %v621_v1, %v144_v3 }
  0x31   :  { %s565_s14 = sld [smem:[#allocation3 + $0x84]]  ;;  %v154_v5 = vstv %s553_s8  ;;  %v153_v12 = vmul.f32 %v152_v4, %v616_v0 }
  0x32   :  { %s567_s15 = sld [smem:[#allocation3 + $0x5]]  ;;  %v163_v6 = vstv %s555_s9  ;;  %v155_v13 = vmul.f32 %v621_v1, %v154_v5  ;;  %v146_v42 = vadd.f32 %v145_v11, %v143_v10 }
  0x33   :  { %s569_s16 = sld [smem:[#allocation3 + $0x85]]  ;;  %v165_v7 = vstv %s557_s10  ;;  %v164_v14 = vmul.f32 %v163_v6, %v616_v0 }
  0x34   :  { %s571_s17 = sld [smem:[#allocation3 + $0x6]]  ;;  %v174_v8 = vstv %s559_s11  ;;  %v166_v15 = vmul.f32 %v621_v1, %v165_v7  ;;  %v156_v43 = vadd.f32 %v155_v13, %v153_v12 }
  0x35   :  { %s573_s18 = sld [smem:[#allocation3 + $0x86]]  ;;  %v176_v9 = vstv %s561_s12  ;;  %v175_v16 = vmul.f32 %v174_v8, %v616_v0 }
  0x36   :  { %s575_s19 = sld [smem:[#allocation3 + $0x7]]  ;;  %v177_v17 = vmul.f32 %v621_v1, %v176_v9  ;;  %v185_v18 = vstv %s563_s13  ;;  %v167_v45 = vadd.f32 %v166_v15, %v164_v14 }
  0x37   :  { %s577_s20 = sld [smem:[#allocation3 + $0x87]]  ;;  %v187_v19 = vstv %s565_s14  ;;  %v186_v28 = vmul.f32 %v185_v18, %v616_v0 }
  0x38   :  { %s579_s21 = sld [smem:[#allocation3 + $0x8]]  ;;  %v196_v20 = vstv %s567_s15  ;;  %v188_v29 = vmul.f32 %v621_v1, %v187_v19  ;;  %v178_v46 = vadd.f32 %v177_v17, %v175_v16 }
  0x39   :  { %s581_s22 = sld [smem:[#allocation3 + $0x88]]  ;;  %v198_v21 = vstv %s569_s16  ;;  %v197_v32 = vmul.f32 %v196_v20, %v616_v0 }
  0x3a   :  { %s583_s23 = sld [smem:[#allocation3 + $0x9]]  ;;  %v207_v22 = vstv %s571_s17  ;;  %v199_v33 = vmul.f32 %v621_v1, %v198_v21  ;;  %v189_v47 = vadd.f32 %v188_v29, %v186_v28 }
  0x3b   :  { %s585_s24 = sld [smem:[#allocation3 + $0x89]]  ;;  %v209_v23 = vstv %s573_s18  ;;  %v208_v34 = vmul.f32 %v207_v22, %v616_v0 }
  0x3c   :  { %s587_s25 = sld [smem:[#allocation3 + $0xa]]  ;;  %v218_v24 = vstv %s575_s19  ;;  %v210_v35 = vmul.f32 %v621_v1, %v209_v23  ;;  %v200_v49 = vadd.f32 %v199_v33, %v197_v32 }
  0x3d   :  { %s589_s26 = sld [smem:[#allocation3 + $0x8a]]  ;;  %v220_v25 = vstv %s577_s20  ;;  %v219_v36 = vmul.f32 %v218_v24, %v616_v0 }
  0x3e   :  { %s591_s2 = sld [smem:[#allocation3 + $0xb]]  ;;  %v229_v26 = vstv %s579_s21  ;;  %v221_v37 = vmul.f32 %v621_v1, %v220_v25  ;;  %v693_v50 = vadd.f32 %v210_v35, %v208_v34 }
  0x3f   :  { %s593_s1 = sld [smem:[#allocation3 + $0x8b]]  ;;  %v231_v27 = vstv %s581_s22  ;;  %v230_v38 = vmul.f32 %v229_v26, %v616_v0 }
  0x40   :  { %s595_s27 = sld [smem:[#allocation3 + $0xc]]  ;;  %v240_v30 = vstv %s583_s23  ;;  %v232_v39 = vmul.f32 %v621_v1, %v231_v27  ;;  %v695_v51 = vadd.f32 %v221_v37, %v219_v36 }
  0x41   :  { %s597_s28 = sld [smem:[#allocation3 + $0x8c]]  ;;  %v242_v31 = vstv %s585_s24  ;;  %v241_v40 = vmul.f32 %v240_v30, %v616_v0 }
  0x42   :  { %875 = sst [smem:[#allocation10_spill]] %s587_s25  ;;  %v243_v41 = vmul.f32 %v621_v1, %v242_v31  ;;  %v697_v52 = vadd.f32 %v232_v39, %v230_v38 }
  0x43   :  { %876 = sst [smem:[#allocation11_spill]] %s589_s26 }
  0x44   :  { %877 = sst [smem:[#allocation12_spill]] %s591_s2  ;;  %v701_v53 = vadd.f32 %v243_v41, %v241_v40 }
  0x45   :  { %878 = sst [smem:[#allocation13_spill]] %s593_s1 }
  0x46   :  { %879 = sst [smem:[#allocation14_spill]] %s595_s27 }
  0x47   :  { %880 = sst [smem:[#allocation15_spill]] %s597_s28 }
  0x48   :  { %s599_s29 = sld [smem:[#allocation3 + $0xd]] }
  0x49   :  { %s601_s30 = sld [smem:[#allocation3 + $0x8d]] }
  0x4a   :  { %s603_s5 = sld [smem:[#allocation3 + $0xe]] }
  0x4b   :  { %s605_s4 = sld [smem:[#allocation3 + $0x8e]] }
  0x4c   :  { %s607_s2 = sld [smem:[#allocation3 + $0xf]] }
  0x4d   :  { %s609_s1 = sld [smem:[#allocation3 + $0x8f]] }
  0x4e   :  { %881 = sst [smem:[#allocation16_spill]] %s599_s29 }
  0x4f   :  { %s611_s26 = sld [smem:[#allocation3 + $0x10]]  ;;  %v286_v63 = vstv %s601_s30 }
  0x50   :  { %882 = sst [smem:[#allocation17_spill]] %s603_s5  ;;  %v287_v13 = vmul.f32 %v621_v1, %v286_v63 }
  0x51   :  { %s625_s5 = sld [smem:[#allocation3 + $0x90]]  ;;  %v297_v6 = vstv %s605_s4 }
  0x52   :  { %s635_s25 = sld [smem:[#allocation3 + $0x91]]  ;;  %v298_v17 = vmul.f32 %v621_v1, %v297_v6  ;;  %v306_v18 = vstv %s607_s2 }
  0x53   :  { %s639_s0 = sld [smem:[#allocation3 + $0x12]]  ;;  %v308_v25 = vstv %s609_s1  ;;  %v307_v30 = vmul.f32 %v306_v18, %v616_v0 }
  0x54   :  { %s645_s6 = sld [smem:[#allocation3 + $0x92]]  ;;  %v309_v37 = vmul.f32 %v621_v1, %v308_v25 }
  0x55   :  { %883 = sst [smem:[#allocation18_spill]] %s611_s26 }
  0x56   :  { %s631_s26 = sld [smem:[#allocation3 + $0x11]] }
  0x57   :  { %s651_s7 = sld [smem:[#allocation3 + $0x13]] }
  0x58   :  { %s657_s3 = sld [smem:[#allocation3 + $0x93]]  ;;  %v330_v6 = vstv %s635_s25 }
  0x59   :  { %s663_s8 = sld [smem:[#allocation5]] }
  0x5a   :  { %s669_s9 = sld [smem:[#allocation5 + $0x1]] }
  0x5b   :  { %s884_s10 = sld [smem:[#allocation10_spill]] }
  0x5c   :  { %s675_s11 = sld [smem:[#allocation5 + $0x2]] }
  0x5d   :  { %s885_s12 = sld [smem:[#allocation11_spill]] }
  0x5e   :  { %s681_s13 = sld [smem:[#allocation5 + $0x3]] }
  0x5f   :  { %s685_s14 = sld [smem:[#allocation5 + $0x4]]  ;;  %v147_v57 = vstv %s663_s8 }
  0x60   :  { %s886_s15 = sld [smem:[#allocation12_spill]]  ;;  %v157_v61 = vstv %s669_s9  ;;  %v148_v7 = vadd.f32 %v147_v57, %v146_v42  ;;  %v319_v42 = vstv %s625_s5 }
  0x61   :  { %s887_s16 = sld [smem:[#allocation13_spill]]  ;;  %v251_v44 = vstv %s884_s10  ;;  %v158_v11 = vadd.f32 %v157_v61, %v156_v43  ;;  %v328_v61 = vstv %s631_s26 }
  0x62   :  { %s688_s17 = sld [smem:[#allocation5 + $0x5]]  ;;  %v252_v54 = vmul.f32 %v251_v44, %v616_v0  ;;  %v168_v3 = vstv %s675_s11  ;;  %v149_v23 = vmax.f32 %v148_v7, 0.0 }
  0x63   :  { %s888_s18 = sld [smem:[#allocation14_spill]]  ;;  %v253_v48 = vstv %s885_s12  ;;  %v169_v15 = vadd.f32 %v168_v3, %v167_v45  ;;  %v159_v27 = vmax.f32 %v158_v11, 0.0 }
  0x64   :  { %s889_s19 = sld [smem:[#allocation15_spill]]  ;;  %v254_v58 = vmul.f32 %v621_v1, %v253_v48  ;;  %v179_v8 = vstv %s681_s13 }
  0x65   :  { %s691_s20 = sld [smem:[#allocation5 + $0x6]]  ;;  %v190_v16 = vstv %s685_s14  ;;  %v180_v19 = vadd.f32 %v179_v8, %v178_v46  ;;  %v170_v31 = vmax.f32 %v169_v15, 0.0 }
  0x66   :  { %s890_s21 = sld [smem:[#allocation16_spill]]  ;;  %v262_v55 = vstv %s886_s15  ;;  %v742_v21 = vadd.f32 %v254_v58, %v252_v54  ;;  %v191_v28 = vadd.f32 %v190_v16, %v189_v47 }
  0x67   :  { %s891_s22 = sld [smem:[#allocation17_spill]]  ;;  %v264_v56 = vstv %s887_s16  ;;  %v263_v4 = vmul.f32 %v262_v55, %v616_v0  ;;  %v181_v36 = vmax.f32 %v180_v19, 0.0 }
  0x68   :  { %s699_s23 = sld [smem:[#allocation5 + $0x7]]  ;;  %v265_v5 = vmul.f32 %v621_v1, %v264_v56  ;;  %v201_v20 = vstv %s688_s17  ;;  %v192_v45 = vmax.f32 %v191_v28, 0.0 }
  0x69   :  { %s706_s24 = sld [smem:[#allocation5 + $0x8]]  ;;  %v273_v59 = vstv %s888_s18  ;;  %v202_v32 = vadd.f32 %v201_v20, %v200_v49  ;;  %v331_v20 = vmul.f32 %v621_v1, %v330_v6 }
  0x6a   :  { %v275_v60 = vstv %s889_s19  ;;  %s712_s27 = sld [smem:[#allocation5 + $0x9]]  ;;  %v274_v9 = vmul.f32 %v273_v59, %v616_v0  ;;  %v744_v22 = vadd.f32 %v265_v5, %v263_v4  ;;  %v320_v5 = vmul.f32 %v621_v1, %v319_v42 }
  0x6b   :  { %s718_s28 = sld [smem:[#allocation5 + $0xa]]  ;;  %v276_v10 = vmul.f32 %v621_v1, %v275_v60  ;;  %v212_v33 = vstv %s691_s20  ;;  %v203_v49 = vmax.f32 %v202_v32, 0.0  ;;  %v788_v60 = vadd.f32 %v309_v37, %v307_v30 }
  0x6c   :  { %v284_v62 = vstv %s890_s21  ;;  %s724_s29 = sld [smem:[#allocation5 + $0xb]]  ;;  %v213_v46 = vadd.f32 %v212_v33, %v693_v50 }
  0x6d   :  { %v295_v2 = vstv %s891_s22  ;;  %s729_s30 = sld [smem:[#allocation7]]  ;;  %v285_v12 = vmul.f32 %v284_v62, %v616_v0  ;;  %v748_v24 = vadd.f32 %v276_v10, %v274_v9 }
  0x6e   :  { %s892_s8 = sld [smem:[#allocation18_spill]]  ;;  %v296_v14 = vmul.f32 %v295_v2, %v616_v0  ;;  %v223_v41 = vstv %s699_s23  ;;  %v214_v2 = vmax.f32 %v213_v46, 0.0 }
  0x6f   :  { %s734_s4 = sld [smem:[#allocation7 + $0x1]]  ;;  %v754_v29 = vadd.f32 %v287_v13, %v285_v12  ;;  %v234_v54 = vstv %s706_s24  ;;  %v224_v58 = vadd.f32 %v223_v41, %v695_v51  ;;  %v329_v12 = vmul.f32 %v328_v61, %v616_v0 }
  0x70   :  { %s739_s9 = sld [smem:[#allocation7 + $0x2]]  ;;  %v760_v34 = vadd.f32 %v298_v17, %v296_v14  ;;  %v245_v50 = vstv %s712_s27  ;;  %v235_v3 = vadd.f32 %v234_v54, %v697_v52  ;;  %v339_v13 = vstv %s639_s0 }
  0x71   :  { %s746_s10 = sld [smem:[#allocation7 + $0x3]]  ;;  %v256_v4 = vstv %s718_s28  ;;  %v225_v9 = vmax.f32 %v224_v58, 0.0  ;;  %v246_v10 = vadd.f32 %v245_v50, %v701_v53  ;;  %v340_v30 = vmul.f32 %v339_v13, %v616_v0 }
  0x72   :  { %s752_s11 = sld [smem:[#allocation7 + $0x4]]  ;;  %v267_v52 = vstv %s724_s29  ;;  %v236_v16 = vmax.f32 %v235_v3, 0.0  ;;  %v257_v17 = vadd.f32 %v256_v4, %v742_v21 }
  0x73   :  { %s757_s2 = sld [smem:[#allocation7 + $0x5]]  ;;  %v150_v35 = vstv %s729_s30 }
  0x74   :  { %v317_v26 = vstv %s892_s8  ;;  %s762_s1 = sld [smem:[#allocation7 + $0x6]]  ;;  %v151_v39 = vmul.f32 %v150_v35, %v149_v23  ;;  %v258_v35 = vmax.f32 %v257_v17, 0.0 }
  0x75   :  { %v318_v38 = vmul.f32 %v317_v26, %v616_v0  ;;  %s767_s12 = sld [smem:[#allocation7 + $0x7]]  ;;  %v160_v40 = vstv %s734_s4  ;;  %v247_v26 = vmax.f32 %v246_v10, 0.0 }
  0x76   :  { %s772_s13 = sld [smem:[#allocation5 + $0xc]]  ;;  %v161_v43 = vmul.f32 %v160_v40, %v159_v27  ;;  %v171_v44 = vstv %s739_s9  ;;  %v268_v27 = vadd.f32 %v267_v52, %v744_v22 }
  0x77   :  { %s776_s14 = sld [smem:[#allocation7 + $0x8]]  ;;  %v172_v47 = vmul.f32 %v171_v44, %v170_v31  ;;  %v182_v48 = vstv %s746_s10  ;;  %v321_v19 = vadd.f32 %v320_v5, %v318_v38  ;;  %v341_v31 = vstv %s645_s6 }
  0x78   :  { %s780_s15 = sld [smem:[#allocation5 + $0xd]]  ;;  %v162_v55 = vadd.f32 %v161_v43, %v151_v39  ;;  %v183_v56 = vmul.f32 %v182_v48, %v181_v36  ;;  %v193_v57 = vstv %s752_s11  ;;  %v350_v38 = vstv %s651_s7 }
  0x79   :  { %s784_s5 = sld [smem:[#allocation7 + $0x9]]  ;;  %v204_v59 = vstv %s757_s2  ;;  %v194_v63 = vmul.f32 %v193_v57, %v192_v45  ;;  %v352_v39 = vstv %s657_s3  ;;  %v269_v42 = vmax.f32 %v268_v27, 0.0 }
  0x7a   :  { %s791_s16 = sld [smem:[#allocation5 + $0xe]]  ;;  %v173_v62 = vadd.f32 %v172_v47, %v162_v55  ;;  %v215_v51 = vstv %s762_s1  ;;  %v205_v8 = vmul.f32 %v204_v59, %v203_v49  ;;  %v342_v46 = vmul.f32 %v621_v1, %v341_v31 }
  0x7b   :  { %s794_s17 = sld [smem:[#allocation7 + $0xa]]  ;;  %v226_v11 = vstv %s767_s12  ;;  %v216_v15 = vmul.f32 %v215_v51, %v214_v2  ;;  %v353_v57 = vmul.f32 %v621_v1, %v352_v39 }
  0x7c   :  { %s800_s18 = sld [smem:[#allocation5 + $0xf]]  ;;  %v184_v7 = vadd.f32 %v183_v56, %v173_v62  ;;  %v278_v18 = vstv %s772_s13  ;;  %v227_v25 = vmul.f32 %v226_v11, %v225_v9 }
  0x7d   :  { %s803_s26 = sld [smem:[#allocation7 + $0xb]]  ;;  %v237_v53 = vstv %s776_s14  ;;  %v279_v36 = vadd.f32 %v278_v18, %v748_v24  ;;  %v332_v24 = vadd.f32 %v331_v20, %v329_v12 }
  0x7e   :  { %s809_s19 = sld [smem:[#allocation5 + $0x10]]  ;;  %v195_v14 = vadd.f32 %v194_v63, %v184_v7  ;;  %v289_v28 = vstv %s780_s15  ;;  %v238_v33 = vmul.f32 %v237_v53, %v236_v16  ;;  %v343_v63 = vadd.f32 %v342_v46, %v340_v30 }
  0x7f   :  { %s812_s25 = sld [smem:[#allocation7 + $0xc]]  ;;  %v248_v21 = vstv %s784_s5  ;;  %v290_v43 = vadd.f32 %v289_v28, %v754_v29  ;;  %v280_v49 = vmax.f32 %v279_v36, 0.0  ;;  %v351_v29 = vmul.f32 %v350_v38, %v616_v0 }
  0x80   :  { %s817_s20 = sld [smem:[#allocation5 + $0x11]]  ;;  %v206_v23 = vadd.f32 %v205_v8, %v195_v14  ;;  %v300_v22 = vstv %s791_s16  ;;  %v249_v41 = vmul.f32 %v248_v21, %v247_v26 }
  0x81   :  { %s820_s0 = sld [smem:[#allocation7 + $0xd]]  ;;  %v259_v37 = vstv %s794_s17  ;;  %v301_v54 = vadd.f32 %v300_v22, %v760_v34  ;;  %v291_v50 = vmax.f32 %v290_v43, 0.0  ;;  %v354_v5 = vadd.f32 %v353_v57, %v351_v29 }
  0x82   :  { %s826_s21 = sld [smem:[#allocation5 + $0x12]]  ;;  %v217_v32 = vadd.f32 %v216_v15, %v206_v23  ;;  %v311_v45 = vstv %s800_s18  ;;  %v260_v48 = vmul.f32 %v259_v37, %v258_v35 }
  0x83   :  { %s829_s22 = sld [smem:[#allocation7 + $0xe]]  ;;  %v270_v44 = vstv %s803_s26  ;;  %v312_v61 = vadd.f32 %v311_v45, %v788_v60  ;;  %v302_v51 = vmax.f32 %v301_v54, 0.0 }
  0x84   :  { %s835_s23 = sld [smem:[#allocation5 + $0x13]]  ;;  %v228_v40 = vadd.f32 %v227_v25, %v217_v32  ;;  %v322_v56 = vstv %s809_s19  ;;  %v271_v59 = vmul.f32 %v270_v44, %v269_v42 }
  0x85   :  { %s838_s6 = sld [smem:[#allocation7 + $0xf]]  ;;  %v281_v55 = vstv %s812_s25  ;;  %v323_v4 = vadd.f32 %v322_v56, %v321_v19  ;;  %v313_v60 = vmax.f32 %v312_v61, 0.0 }
  0x86   :  { %v239_v47 = vadd.f32 %v238_v33, %v228_v40  ;;  %s844_s7 = sld [smem:[#allocation7 + $0x10]]  ;;  %v333_v34 = vstv %s817_s20  ;;  %v282_v3 = vmul.f32 %v281_v55, %v280_v49 }
  0x87   :  { %s851_s3 = sld [smem:[#allocation7 + $0x11]]  ;;  %v292_v62 = vstv %s820_s0  ;;  %v334_v8 = vadd.f32 %v333_v34, %v332_v24  ;;  %v324_v12 = vmax.f32 %v323_v4, 0.0 }
  0x88   :  { %v250_v58 = vadd.f32 %v249_v41, %v239_v47  ;;  %s455_s24 = sld [smem:[#allocation7 + $0x12]]  ;;  %v344_v1 = vstv %s826_s21  ;;  %v293_v7 = vmul.f32 %v292_v62, %v291_v50 }
  0x89   :  { %v303_v0 = vstv %s829_s22  ;;  %s456_s27 = sld [smem:[#allocation7 + $0x13]]  ;;  %v345_v13 = vadd.f32 %v344_v1, %v343_v63  ;;  %v335_v17 = vmax.f32 %v334_v8, 0.0 }
  0x8a   :  { %v261_v2 = vadd.f32 %v260_v48, %v250_v58  ;;  %v355_v10 = vstv %s835_s23  ;;  %v304_v52 = vmul.f32 %v303_v0, %v302_v51  ;;  %s893_s30 = sld [smem:[#allocation19_spill]] }
  0x8b   :  { %v314_v9 = vstv %s838_s6  ;;  %v356_v53 = vadd.f32 %v355_v10, %v354_v5  ;;  %v346_v23 = vmax.f32 %v345_v13, 0.0  ;;  %s894_s9 = sld [smem:[#allocation20_spill]] }
  0x8c   :  { %v272_v6 = vadd.f32 %v271_v59, %v261_v2  ;;  %v325_v14 = vstv %s844_s7  ;;  %v315_v16 = vmul.f32 %v314_v9, %v313_v60 }
  0x8d   :  { %v336_v18 = vstv %s851_s3  ;;  %v326_v20 = vmul.f32 %v325_v14, %v324_v12  ;;  %v357_v21 = vmax.f32 %v356_v53, 0.0 }
  0x8e   :  { %v283_v11 = vadd.f32 %v282_v3, %v272_v6  ;;  %v347_v25 = vstv %s455_s24  ;;  %v337_v27 = vmul.f32 %v336_v18, %v335_v17 }
  0x8f   :  { %v358_v28 = vstv %s456_s27  ;;  %v348_v31 = vmul.f32 %v347_v25, %v346_v23 }
  0x90   :  { %v294_v15 = vadd.f32 %v293_v7, %v283_v11  ;;  %v359_v33 = vmul.f32 %v358_v28, %v357_v21  ;;  %v361_v36 = vstv %s893_s30 }
  0x92   :  { %v305_v19 = vadd.f32 %v304_v52, %v294_v15 }
  0x94   :  { %v316_v26 = vadd.f32 %v315_v16, %v305_v19 }
  0x96   :  { %v327_v30 = vadd.f32 %v326_v20, %v316_v26 }
  0x98   :  { %v338_v32 = vadd.f32 %v337_v27, %v327_v30 }
  0x9a   :  { %v349_v35 = vadd.f32 %v348_v31, %v338_v32 }
  0x9c   :  { %v360_v37 = vadd.f32 %v359_v33, %v349_v35 }
  0x9e   :  { %v362_v22 = vadd.f32 %v361_v36, %v360_v37 }
  0xa0   :  { %v363_v38 = vmax.f32 %v362_v22, -30.0 }
  0xa2   :  { %v364_v39 = vsub.f32 0.0, %v363_v38 }
  0xa4   :  { %v365_v40 = vmul.f32 1.442695, %v364_v39 }
  0xa6   :  { %461 = vpow2.f32 %v365_v40 }
  0xb3   :  { %v462_v41 = vpop.eup %461 }
  0xb4   :  { %v367_v42 = vadd.f32 1.0, %v462_v41 }
  0xb6   :  { %463 = vrcp.f32 %v367_v42 }
  0xc3   :  { %v464_v43 = vpop.eup %463 }
  0xc4   :  { %v369_v44 = vmul.f32 %v464_v43, %v367_v42 }
  0xc6   :  { %v370_v45 = vsub.f32 2.0, %v369_v44 }
  0xc8   :  { %v371_v24 = vmul.f32 %v464_v43, %v370_v45 }
  0xca   :  { %372 = vst [vmem:[%s894_s9] sm:$0xff] %v371_v24 }
  0xcb   :  { %377 = vsyncpa [#allocation4], 1 }
  0xcc   :  { %378 = vsyncpa [#allocation6], 1 }

</bundles_post_ra>
